<compile_context>
chip_gen: v6e
topology: v6e:2x2x1
jax: 0.10.0
libtpu: 0.0.40
codegen_flags: <defaults>
</compile_context>

<pallas_src>
import functools

import jax
import jax.numpy as jnp
from jax import lax
from jax.experimental import pallas as pl
from jax.experimental.pallas import tpu as pltpu


_STORAGE_DTYPES = {"uint8": jnp.uint8, "int8": jnp.int8}


# --------------------------------------------------------------------------- kernels
def _dequant_rowwise_kernel(w_ref, s_ref, z_ref, o_ref):
    # w_ref: (TR, S) quantized rows; s_ref/z_ref: (TR, 1) compute dtype; o_ref: (TR, S).
    cdt = s_ref.dtype
    o_ref[...] = (z_ref[...] + w_ref[...].astype(cdt) * s_ref[...]).astype(o_ref.dtype)


def _dequant_mxu_kernel(group_size, sz_ref, w_ref, o_ref):
    # sz_ref: (2, TR, Gp) compute dtype -- plane 0 = scale, plane 1 = zero_point
    # w_ref:  (TR, G*S) quantized, lane dense
    # o_ref:  (TR, G*S) result dtype, lane dense
    cdt = sz_ref.dtype
    tr, gs = w_ref.shape
    gp = sz_ref.shape[-1]  # group count padded up to a sublane multiple (zero-filled)
    # One-hot (Gp, GS) expansion built on the fly from iotas (cheap VPU work, overlapped
    # with the block DMA; never materialised in HBM). Padded group rows are all-zero.
    grp = lax.broadcasted_iota(jnp.int32, (gp, gs), 0)
    col = lax.broadcasted_iota(jnp.int32, (gp, gs), 1)
    expand = jnp.logical_and(col >= grp * group_size,
                             col < (grp + 1) * group_size).astype(cdt)
    # Single fused MXU matmul broadcasting BOTH scale and zero across the group columns;
    # exact because `expand` is one-hot 0/1.
    sz = jnp.concatenate((sz_ref[0], sz_ref[1]), axis=0)             # (2*TR, Gp)
    full = jnp.dot(sz, expand, preferred_element_type=jnp.float32)   # (2*TR, GS)
    s_full = full[:tr]
    z_full = full[tr:]
    o_ref[...] = (z_full + w_ref[...].astype(cdt) * s_full).astype(o_ref.dtype)


# --------------------------------------------------------------------------- sizing
def _vmem_limits():
    """(vmem_limit_bytes, block-picker byte budget) adapted to the local TPU generation."""
    try:
        info = pltpu.get_tpu_info()
        phys = int(getattr(info, "vmem_capacity_bytes", 64 << 20))
    except Exception:
        phys = 64 << 20  # conservative default: v7x per-TensorCore VMEM
    limit = min((phys * 3) // 4, 100 << 20)     # headroom for compiler scratch
    budget = min((limit * 7) // 10, 48 << 20)   # double-buffered blocks + temps
    return limit, budget


def _pick_block_rows(n_rows, per_row_bytes, budget_bytes):
    """Largest multiple-of-32 row block fitting the budget, keeping >= 2 grid steps."""
    cap = max(1, budget_bytes // max(per_row_bytes, 1))
    cap = min(cap, n_rows)
    if n_rows >= 64:
        # Keep at least two grid steps so v7x megacore can shard rows across its 2 TCs.
        cap = min(cap, -(-n_rows // 2))
    if n_rows >= 32:
        return int(max(32, (cap // 32) * 32))
    return int(n_rows)


# --------------------------------------------------------------------------- wrapper
def dequantize_asymmetric(weight, scale, zero_point, result_dtype, result_shape,
                          *, compute_dtype=jnp.float32, block_rows=None):
    """Pallas implementation of SDNQ dequantize_asymmetric.

    weight:     (O, G, S) quantized weights (uint8 / int8)
    scale:      (O, G, 1) per-group scale
    zero_point: (O, G, 1) per-group zero point (pre-scaled, addcmul form)
    returns:    `result_shape` array of `result_dtype`
    """
    O, G, S = weight.shape
    GS = G * S
    result_dtype = jnp.dtype(result_dtype)
    compute_dtype = jnp.dtype(compute_dtype)
    out_bytes = result_dtype.itemsize
    c_bytes = compute_dtype.itemsize
    vmem_limit, vmem_budget = _vmem_limits()

    lane_dense_groups = (S % 128 == 0)
    lane_dense_flat = (GS % 128 == 0)

    if lane_dense_groups or not lane_dense_flat:
        # ---- Row-wise VPU path: present everything as (O*G, S). Optimal when
        # S % 128 == 0; also the correct fallback when even G*S is not a lane multiple.
        # TODO(synk): the fallback case (G*S % 128 != 0) pays masked partial stores.
        R = O * G
        w2 = weight.reshape(R, S)
        s2 = scale.reshape(R, 1).astype(compute_dtype)
        z2 = zero_point.reshape(R, 1).astype(compute_dtype)
        # Per block row: double-buffered quantized-in + out, ~2 compute temps, plus the
        # lane-padded (x128) scale / zero blocks (2 arrays x 2 buffers).
        per_row = S * (2 * (1 + out_bytes) + 2 * c_bytes) + 2 * 2 * 128 * c_bytes
        tr = block_rows if block_rows is not None else _pick_block_rows(R, per_row, vmem_budget)
        grid = (pl.cdiv(R, tr),)
        cost = pl.CostEstimate(
            flops=2 * R * S, transcendentals=0,
            bytes_accessed=R * S * (1 + out_bytes) + 2 * R * c_bytes)
        out2 = pl.pallas_call(
            _dequant_rowwise_kernel,
            out_shape=jax.ShapeDtypeStruct((R, S), result_dtype),
            grid=grid,
            in_specs=[
                pl.BlockSpec((tr, S), lambda i: (i, 0)),
                pl.BlockSpec((tr, 1), lambda i: (i, 0)),
                pl.BlockSpec((tr, 1), lambda i: (i, 0)),
            ],
            out_specs=pl.BlockSpec((tr, S), lambda i: (i, 0)),
            compiler_params=pltpu.CompilerParams(
                dimension_semantics=("parallel",),
                vmem_limit_bytes=vmem_limit),
            cost_estimate=cost,
        )(w2, s2, z2)
        return out2.reshape(result_shape)

    # ---- MXU one-hot broadcast path: S is not a lane multiple but G*S is. Keep the big
    # tensors lane dense as (O, G*S); broadcast scale/zero across group columns on the
    # otherwise-idle MXU with one fused matmul per block.
    w2 = weight.reshape(O, GS)
    s2 = scale.reshape(O, G).astype(compute_dtype)
    z2 = zero_point.reshape(O, G).astype(compute_dtype)
    Gp = max(8, -(-G // 8) * 8)
    if Gp != G:
        pad = ((0, 0), (0, Gp - G))
        s2 = jnp.pad(s2, pad)
        z2 = jnp.pad(z2, pad)
    sz = jnp.stack([s2, z2], axis=0)                                   # (2, O, Gp)

    # Per block row: quantized-in + out (double-buffered), one compute-dtype temp for the
    # cast weight, the fused f32 matmul result (2 halves), plus lane-padded sz blocks.
    per_row = GS * (2 * (1 + out_bytes) + c_bytes + 2 * 4) + 2 * 2 * max(Gp, 128) * c_bytes
    tr = block_rows if block_rows is not None else _pick_block_rows(O, per_row, vmem_budget)
    grid = (pl.cdiv(O, tr),)
    cost = pl.CostEstimate(
        flops=2 * O * GS + 2 * (2 * O) * Gp * GS, transcendentals=0,
        bytes_accessed=O * GS * (1 + out_bytes) + 2 * O * Gp * c_bytes)
    out2 = pl.pallas_call(
        functools.partial(_dequant_mxu_kernel, S),
        out_shape=jax.ShapeDtypeStruct((O, GS), result_dtype),
        grid=grid,
        in_specs=[
            pl.BlockSpec((2, tr, Gp), lambda i: (0, i, 0)),   # stacked scale/zero
            pl.BlockSpec((tr, GS), lambda i: (i, 0)),         # weight (lane dense)
        ],
        out_specs=pl.BlockSpec((tr, GS), lambda i: (i, 0)),
        compiler_params=pltpu.CompilerParams(
            dimension_semantics=("parallel",),
            vmem_limit_bytes=vmem_limit),
        cost_estimate=cost,
    )(sz, w2)
    return out2.reshape(result_shape)


# --------------------------------------------------------------------------- module
class AsymmetricWeightsDequantizer:
    """JAX mirror of the PyTorch module (buffers held as attributes)."""

    def __init__(self, scale, zero_point, result_dtype, result_shape,
                 original_shape, weights_dtype, **kwargs):
        self.weights_dtype = weights_dtype
        self.original_shape = original_shape
        self.use_quantized_matmul = False
        self.result_dtype = result_dtype
        self.result_shape = result_shape
        self.scale = scale
        self.zero_point = zero_point

    def pack_weight(self, weight):
        return weight.astype(_STORAGE_DTYPES.get(self.weights_dtype, jnp.uint8))

    def __call__(self, weight, **kwargs):
        return dequantize_asymmetric(weight, self.scale, self.zero_point,
                                     self.result_dtype, self.result_shape)


# --------------------------------------------------------------------------- test
if __name__ == "__main__":
    key = jax.random.PRNGKey(0)
    keys = jax.random.split(key, 9)

    def make_inputs(kw, ks, kz, O, G, S):
        w = jax.random.randint(kw, (O, G, S), 0, 256, dtype=jnp.int32).astype(jnp.uint8)
        s = jax.random.uniform(ks, (O, G, 1), jnp.float32) * 0.05 + 0.01
        z = jax.random.uniform(kz, (O, G, 1), jnp.float32) * (-2.0)
        return w, s, z

    def ref_dequant(w, s, z, rdt, rshape):
        r = (z + w.astype(jnp.float32) * s).astype(rdt).reshape(rshape)
        return r.astype(jnp.float32)

    # Case 1: group_size multiple of 128 -> lane-dense row-wise VPU path (auto tiles).
    O1, G1, S1 = 256, 4, 128
    w1, s1, z1 = make_inputs(keys[0], keys[1], keys[2], O1, G1, S1)
    shape1 = (O1, G1 * S1)
    deq = AsymmetricWeightsDequantizer(s1, z1, jnp.bfloat16, shape1, shape1, "uint8")
    out1 = jax.block_until_ready(deq(deq.pack_weight(w1)))
    assert out1.shape == shape1 and out1.dtype == jnp.dtype(jnp.bfloat16)
    assert jnp.allclose(out1.astype(jnp.float32),
                        ref_dequant(w1, s1, z1, jnp.bfloat16, shape1),
                        atol=1e-1, rtol=2e-2)

    # Case 2: group_size 32 (not /128) but G*S /128 -> fused MXU one-hot broadcast path,
    # forced small row block to exercise a multi-step grid.
    O2, G2, S2 = 192, 4, 32
    w2, s2, z2 = make_inputs(keys[3], keys[4], keys[5], O2, G2, S2)
    shape2 = (O2, G2 * S2)
    out2 = jax.block_until_ready(
        dequantize_asymmetric(w2, s2, z2, jnp.bfloat16, shape2, block_rows=64))
    assert out2.shape == shape2 and out2.dtype == jnp.dtype(jnp.bfloat16)
    assert jnp.allclose(out2.astype(jnp.float32),
                        ref_dequant(w2, s2, z2, jnp.bfloat16, shape2),
                        atol=1e-1, rtol=2e-2)

    # Case 3: ragged row grid (rows not a multiple of the block) + f32 output,
    # row-wise path: R = O*G = 208 rows, block 64 -> 4 steps with a partial last block.
    O3, G3, S3 = 104, 2, 128
    w3, s3, z3 = make_inputs(keys[6], keys[7], keys[8], O3, G3, S3)
    shape3 = (O3, G3 * S3)
    out3 = jax.block_until_ready(
        dequantize_asymmetric(w3, s3, z3, jnp.float32, shape3, block_rows=64))
    assert out3.shape == shape3 and out3.dtype == jnp.dtype(jnp.float32)
    assert jnp.allclose(out3, ref_dequant(w3, s3, z3, jnp.float32, shape3),
                        atol=1e-5, rtol=1e-5)

    print("KERNEL_OK")
</pallas_src>

<mosaic_0001>
module attributes {stable_mosaic.version = 11 : i64} {
  func.func @_dequant_rowwise_kernel(%arg0: i32, %arg1: memref<512x128xi8, #tpu.memory_space<vmem>>, %arg2: memref<512x1xf32, #tpu.memory_space<vmem>>, %arg3: memref<512x1xf32, #tpu.memory_space<vmem>>, %arg4: memref<512x128xbf16, #tpu.memory_space<vmem>>) attributes {dimension_semantics = [#tpu.dimension_semantics<parallel>], iteration_bounds = array<i64: 2>, scalar_prefetch = 0 : i64, scratch_operands = 0 : i64, tpu.core_type = #tpu.core_type<tc>, window_params = [{transform_indices = @transform_0, window_bounds = array<i64: 512, 128>}, {transform_indices = @transform_1, window_bounds = array<i64: 512, 1>}, {transform_indices = @transform_2, window_bounds = array<i64: 512, 1>}, {transform_indices = @transform_3, window_bounds = array<i64: 512, 128>}]} {
    %c0 = arith.constant 0 : index
    %c0_0 = arith.constant 0 : index
    %0 = vector.load %arg3[%c0, %c0_0] : memref<512x1xf32, #tpu.memory_space<vmem>>, vector<512x1xf32>
    %c0_1 = arith.constant 0 : index
    %c0_2 = arith.constant 0 : index
    %1 = vector.load %arg1[%c0_1, %c0_2] : memref<512x128xi8, #tpu.memory_space<vmem>>, vector<512x128xi8>
    %2 = arith.uitofp %1 : vector<512x128xi8> to vector<512x128xf32>
    %c0_3 = arith.constant 0 : index
    %c0_4 = arith.constant 0 : index
    %3 = vector.load %arg2[%c0_3, %c0_4] : memref<512x1xf32, #tpu.memory_space<vmem>>, vector<512x1xf32>
    %4 = vector.broadcast %3 : vector<512x1xf32> to vector<512x128xf32>
    %5 = arith.mulf %2, %4 : vector<512x128xf32>
    %6 = vector.broadcast %0 : vector<512x1xf32> to vector<512x128xf32>
    %7 = arith.addf %6, %5 : vector<512x128xf32>
    %8 = arith.truncf %7 : vector<512x128xf32> to vector<512x128xbf16>
    %c0_5 = arith.constant 0 : index
    %c0_6 = arith.constant 0 : index
    %9 = vector.load %arg4[%c0_5, %c0_6] : memref<512x128xbf16, #tpu.memory_space<vmem>>, vector<512x128xbf16>
    tpu.vector_store %arg4[%c0_5, %c0_6], %8 {strides = array<i32>} : memref<512x128xbf16, #tpu.memory_space<vmem>>, vector<512x128xbf16>,
    return
  }
  func.func @transform_0(%arg0: i32) -> (i32, i32) {
    %c0_i32 = arith.constant 0 : i32
    %c0_i32_0 = arith.constant 0 : i32
    return %arg0, %c0_i32 : i32, i32
  }
  func.func @transform_1(%arg0: i32) -> (i32, i32) {
    %c0_i32 = arith.constant 0 : i32
    %c0_i32_0 = arith.constant 0 : i32
    return %arg0, %c0_i32 : i32, i32
  }
  func.func @transform_2(%arg0: i32) -> (i32, i32) {
    %c0_i32 = arith.constant 0 : i32
    %c0_i32_0 = arith.constant 0 : i32
    return %arg0, %c0_i32 : i32, i32
  }
  func.func @transform_3(%arg0: i32) -> (i32, i32) {
    %c0_i32 = arith.constant 0 : i32
    %c0_i32_0 = arith.constant 0 : i32
    return %arg0, %c0_i32 : i32, i32
  }
}

</mosaic_0001>

<bundles_post_ra>
// kernel: tpu_custom_call.1
= control target key start
LH: loop header
LB: loop body
LE: loop exit
PB: predicated region body
PF: predicated region fallthrough
CT: control target
= control target key end

     0   :  { %8 = vsyncpa [#allocation3], 0  ;;  %s2702_s0 = inlined_call_operand.vmem [shape: u8[1024,128], index: 0, kind: input, shape index: {}]   ;;  %s2703_s1 = inlined_call_operand.vmem [shape: f32[1024,1], index: 1, kind: input, shape index: {}]   ;;  %s2704_s2 = inlined_call_operand.vmem [shape: f32[1024,1], index: 2, kind: input, shape index: {}]   ;;  %s2705_s3 = inlined_call_operand.hbm [shape: bf16[1024,128], index: 3, kind: output, shape index: {}]  }
   0x1   :  { %10 = vsyncpa [#allocation3 + $0x1], 0  ;;  %s2206_s12 = smov 0   ;;  %s2208_s13 = smov 0  }
   0x2   :  { %s2210_s14 = smov 0   ;;  %s2212_s15 = smov 0  }
   0x3 LB: > { %s2227_s16 = sadd.s32 4294967295, %s2180_s15   ;;  %s1740_s17 = sadd.s32 4294967294, %s2180_s15   ;;  %s2180_s15 = sphi %s2212_s15, %s2761_s15   ;;  %s2176_s14 = sphi %s2210_s14, %s2760_s14   ;;  %s2172_s13 = sphi %s2208_s13, %s2759_s13   ;;  %s2168_s12 = sphi %s2206_s12, %s2758_s12  }
   0x4   : > { %s2231_s18 = sadd.s32 1, %s2180_s15   ;;  %s101_s19 = sadd.s32 1, %s2176_s14 }
   0x5   : > { %s98_s20 = ssub.s32 %s2180_s15, %s2231_s18  ;;  %p111_p0 = scmp.ne.s32.totalorder %s2176_s14, %s2172_s13 }
   0x6   : > { %p99_p1 = scmp.eq.s32.totalorder %s98_s20, 0  ;;  %p112_p2 = scmp.eq.s32.totalorder %s2227_s16, 1 }
   0x7   : > { %p117_p3 = scmp.ne.s32.totalorder %s2172_s13, %s2168_s12  ;;  %p118_p4 = scmp.eq.s32.totalorder %s1740_s17, 1 }
   0x8   : > { %s2242_s21 = scalar_select %p99_p1, %s2176_s14, %s101_s19  }
   0x9   : > { %p2244_p5 = por %p112_p2, %p111_p0  ;;  %p2248_p6 = por %p118_p4, %p117_p3 }
   0xa   : > { %p1743_p7 = scmp.ge.s32.totalorder %s2180_s15, 1  ;;  %p163_p8 = scmp.lt.s32.totalorder %s2180_s15, 3 }
   0xc   : > { %p164_p9 = pnand %p1743_p7, %p163_p8 }
   0xe   : > { %167 = sbr.rel (%p164_p9) target bundleno = 420 (0x1a4), region = 32 }
  0x13   : > { %s1747_s24 = sshll.u32 %s2227_s16, 6  ;;  %v2182_v0 = vmov 0   ;;  %s1745_s5 = sshll.u32 %s2227_s16, 4 }
  0x14   : > { %2119 = vset.pattern.permute.xlu1 %v2182_v0  ;;  %2118 = vset.pattern.permute.xlu0 %v2182_v0  ;;  %p204_p10 = scmp.lt.s32.totalorder %s1747_s24, 127  ;;  %p198_p11 = scmp.lt.s32.totalorder %s1745_s5, 31 }
  0x15   : > { %s194_s10 = sand.u32 1, %s2172_s13   ;;  %s1884_s19 = sshll.u32 %s2227_s16, 12 }
  0x16   : > { %s2763_s24 = smov (!%p204_p10, %s1747_s24), 127  ;;  %s2765_s5 = smov (!%p198_p11, %s1745_s5), 31 }
  0x17   : > { %s1748_s25 = sshll.u32 %s2763_s24, 3  ;;  %s1746_s6 = sshll.u32 %s2765_s5, 3 }
  0x18   : > { %s2263_s28 = scalar_lea.vmem %s2703_s1, %s1748_s25  ;;  %s2334_s4 = scalar_lea.vmem %s2704_s2, %s1748_s25 }
  0x19   : > { %v490_v1 = vld [vmem:[%s2263_s28 + $0x10] sm:$0xff]  ;;  %v488_v2 = vld [vmem:[%s2263_s28] sm:$0xff]  ;;  %v491_v3 = vld [vmem:[%s2263_s28 + $0x18] sm:$0xff]  ;;  %s2506_s9 = scalar_lea.vmem %s2702_s0, %s1746_s6  ;;  %s1744_s11 = sshll.u32 %s194_s10, 8 }
  0x1a   : > { %564 = vperm.xlu1 %2119, %v490_v1   ;;  %554 = vperm.xlu0 %2118, %v488_v2   ;;  %v489_v4 = vld [vmem:[%s2263_s28 + $0x8] sm:$0xff]  ;;  %v492_v6 = vld [vmem:[%s2263_s28 + $0x20] sm:$0xff]  ;;  %v495_v7 = vld [vmem:[%s2263_s28 + $0x38] sm:$0xff]  ;;  %s2544_s17 = scalar_lea.vmem [#allocation2], %s1744_s11  ;;  %s2655_s26 = scalar_lea.hbm %s2705_s3, %s1884_s19 }
  0x1b   : > { %v493_v5 = vld [vmem:[%s2263_s28 + $0x28] sm:$0xff]  ;;  %v494_v8 = vld [vmem:[%s2263_s28 + $0x30] sm:$0xff]  ;;  %v496_v10 = vld [vmem:[%s2263_s28 + $0x40] sm:$0xff]  ;;  %s1654_s20 = sshll.u32 %s2544_s17, 4  ;;  %s2662_s16 = scalar_lea.sflag [#allocation3], %s194_s10  ;;  %s2657_s20 = int_to_ptr.vmem [resolvable:$true] %s1654_s20 }
  0x1c   : > { %v497_v9 = vld [vmem:[%s2263_s28 + $0x48] sm:$0xff]  ;;  %v499_v11 = vld [vmem:[%s2263_s28 + $0x58] sm:$0xff]  ;;  %v498_v12 = vld [vmem:[%s2263_s28 + $0x50] sm:$0xff]  ;;  %s2120_s27 = scalar_lea.vmem %s2657_s20, 4096 }
  0x1d   : > { %v501_v13 = vld [vmem:[%s2263_s28 + $0x68] sm:$0xff]  ;;  %v500_v14 = vld [vmem:[%s2263_s28 + $0x60] sm:$0xff]  ;;  %v503_v15 = vld [vmem:[%s2263_s28 + $0x78] sm:$0xff]  ;;  %p2121_p12 = scmp.ne.s32.totalorder %s2657_s20, %s2120_s27 }
  0x1e   : > { %569 = vperm.xlu1 %2119, %v491_v3   ;;  %559 = vperm.xlu0 %2118, %v489_v4   ;;  %v502_v16 = vld [vmem:[%s2263_s28 + $0x70] sm:$0xff]  ;;  %v505_v17 = vld [vmem:[%s2263_s28 + $0x88] sm:$0xff]  ;;  %v504_v18 = vld [vmem:[%s2263_s28 + $0x80] sm:$0xff] }
  0x1f   : > { %v507_v19 = vld [vmem:[%s2263_s28 + $0x98] sm:$0xff]  ;;  %v506_v20 = vld [vmem:[%s2263_s28 + $0x90] sm:$0xff]  ;;  %v509_v21 = vld [vmem:[%s2263_s28 + $0xa8] sm:$0xff]  ;;  %p2122_p13 = pnand %p2121_p12, %p2244_p5 }
  0x20   : > { %v508_v22 = vld [vmem:[%s2263_s28 + $0xa0] sm:$0xff]  ;;  %v511_v23 = vld [vmem:[%s2263_s28 + $0xb8] sm:$0xff]  ;;  %v510_v24 = vld [vmem:[%s2263_s28 + $0xb0] sm:$0xff] }
  0x21   : > { %v513_v25 = vld [vmem:[%s2263_s28 + $0xc8] sm:$0xff]  ;;  %v512_v26 = vld [vmem:[%s2263_s28 + $0xc0] sm:$0xff]  ;;  %v515_v27 = vld [vmem:[%s2263_s28 + $0xd8] sm:$0xff]  ;;  %p2123_p0 = pneg %p2122_p13 }
  0x22   : > { %579 = vperm.xlu1 %2119, %v493_v5   ;;  %574 = vperm.xlu0 %2118, %v492_v6   ;;  %v514_v28 = vld [vmem:[%s2263_s28 + $0xd0] sm:$0xff]  ;;  %v517_v29 = vld [vmem:[%s2263_s28 + $0xe8] sm:$0xff]  ;;  %v516_v30 = vld [vmem:[%s2263_s28 + $0xe0] sm:$0xff] }
  0x23   : > { %v519_v31 = vld [vmem:[%s2263_s28 + $0xf8] sm:$0xff]  ;;  %v518_v32 = vld [vmem:[%s2263_s28 + $0xf0] sm:$0xff]  ;;  %v521_v33 = vld [vmem:[%s2263_s28 + $0x108] sm:$0xff] }
  0x24   : > { %v520_v34 = vld [vmem:[%s2263_s28 + $0x100] sm:$0xff]  ;;  %v523_v35 = vld [vmem:[%s2263_s28 + $0x118] sm:$0xff]  ;;  %v522_v36 = vld [vmem:[%s2263_s28 + $0x110] sm:$0xff] }
  0x25   : > { %v525_v37 = vld [vmem:[%s2263_s28 + $0x128] sm:$0xff]  ;;  %v524_v38 = vld [vmem:[%s2263_s28 + $0x120] sm:$0xff]  ;;  %v527_v39 = vld [vmem:[%s2263_s28 + $0x138] sm:$0xff] }
  0x26   : > { %589 = vperm.xlu1 %2119, %v495_v7   ;;  %584 = vperm.xlu0 %2118, %v494_v8   ;;  %v526_v40 = vld [vmem:[%s2263_s28 + $0x130] sm:$0xff]  ;;  %v529_v41 = vld [vmem:[%s2263_s28 + $0x148] sm:$0xff]  ;;  %v528_v42 = vld [vmem:[%s2263_s28 + $0x140] sm:$0xff] }
  0x27   : > { %v531_v43 = vld [vmem:[%s2263_s28 + $0x158] sm:$0xff]  ;;  %v530_v44 = vld [vmem:[%s2263_s28 + $0x150] sm:$0xff]  ;;  %v533_v45 = vld [vmem:[%s2263_s28 + $0x168] sm:$0xff] }
  0x28   : > { %v532_v46 = vld [vmem:[%s2263_s28 + $0x160] sm:$0xff]  ;;  %v535_v47 = vld [vmem:[%s2263_s28 + $0x178] sm:$0xff]  ;;  %v534_v48 = vld [vmem:[%s2263_s28 + $0x170] sm:$0xff] }
  0x29   : > { %v537_v49 = vld [vmem:[%s2263_s28 + $0x188] sm:$0xff]  ;;  %v536_v50 = vld [vmem:[%s2263_s28 + $0x180] sm:$0xff]  ;;  %v539_v51 = vld [vmem:[%s2263_s28 + $0x198] sm:$0xff] }
  0x2a   : > { %599 = vperm.xlu1 %2119, %v497_v9   ;;  %594 = vperm.xlu0 %2118, %v496_v10   ;;  %v538_v52 = vld [vmem:[%s2263_s28 + $0x190] sm:$0xff]  ;;  %v541_v53 = vld [vmem:[%s2263_s28 + $0x1a8] sm:$0xff]  ;;  %v540_v54 = vld [vmem:[%s2263_s28 + $0x1a0] sm:$0xff] }
  0x2b   : > { %v543_v55 = vld [vmem:[%s2263_s28 + $0x1b8] sm:$0xff]  ;;  %v542_v56 = vld [vmem:[%s2263_s28 + $0x1b0] sm:$0xff]  ;;  %v545_v57 = vld [vmem:[%s2263_s28 + $0x1c8] sm:$0xff] }
  0x2c   : > { %v544_v58 = vld [vmem:[%s2263_s28 + $0x1c0] sm:$0xff]  ;;  %v547_v59 = vld [vmem:[%s2263_s28 + $0x1d8] sm:$0xff]  ;;  %v546_v60 = vld [vmem:[%s2263_s28 + $0x1d0] sm:$0xff] }
  0x2d   : > { %v549_v61 = vld [vmem:[%s2263_s28 + $0x1e8] sm:$0xff]  ;;  %v548_v62 = vld [vmem:[%s2263_s28 + $0x1e0] sm:$0xff]  ;;  %v551_v63 = vld [vmem:[%s2263_s28 + $0x1f8] sm:$0xff] }
  0x2e   : > { %609 = vperm.xlu1 %2119, %v499_v11   ;;  %604 = vperm.xlu0 %2118, %v498_v12   ;;  %v550_v0 = vld [vmem:[%s2263_s28 + $0x1f0] sm:$0xff]  ;;  %v217_v3 = vld [vmem:[%s2334_s4 + $0x8] sm:$0xff]  ;;  %v216_v4 = vld [vmem:[%s2334_s4] sm:$0xff]  ;;  %s2183_s28 = smov [#allocation2]  }
  0x2f   : > { %v219_v7 = vld [vmem:[%s2334_s4 + $0x18] sm:$0xff]  ;;  %v218_v8 = vld [vmem:[%s2334_s4 + $0x10] sm:$0xff]  ;;  %v221_v11 = vld [vmem:[%s2334_s4 + $0x28] sm:$0xff]  ;;  %s2124_s29 = sshll.u32 %s2183_s28, 4  ;;  %s2125_s29 = int_to_ptr.vmem [resolvable:$false] %s2124_s29 }
  0x30   : > { %v220_v12 = vld [vmem:[%s2334_s4 + $0x20] sm:$0xff]  ;;  %s2126_s30 = scalar_lea.vmem %s2125_s29, 8192  ;;  %p2127_p1 = scmp.lt.s32.totalorder %s2657_s20, %s2125_s29 }
  0x31   : > { %p2128_p2 = scmp.lt.s32.totalorder %s2126_s30, %s2120_s27 }
  0x32   : > { %619 = vperm.xlu1 %2119, %v501_v13   ;;  %614 = vperm.xlu0 %2118, %v500_v14  }
  0x33   : > { %p2129_p3 = por %p2128_p2, %p2127_p1 }
  0x35   : > { %p2130_p4 = pnand %p2129_p3, %p2123_p0 }
  0x36   : > { %629 = vperm.xlu1 %2119, %v503_v15   ;;  %624 = vperm.xlu0 %2118, %v502_v16   ;;  %v223_v15 = vld [vmem:[%s2334_s4 + $0x38] sm:$0xff]  ;;  %v222_v16 = vld [vmem:[%s2334_s4 + $0x30] sm:$0xff] }
  0x3a   : > { %639 = vperm.xlu1 %2119, %v505_v17   ;;  %634 = vperm.xlu0 %2118, %v504_v18  }
  0x3e   : > { %649 = vperm.xlu1 %2119, %v507_v19   ;;  %644 = vperm.xlu0 %2118, %v506_v20   ;;  %v225_v19 = vld [vmem:[%s2334_s4 + $0x48] sm:$0xff]  ;;  %v224_v20 = vld [vmem:[%s2334_s4 + $0x40] sm:$0xff] }
  0x42   : > { %659 = vperm.xlu1 %2119, %v509_v21   ;;  %654 = vperm.xlu0 %2118, %v508_v22  }
  0x46   : > { %669 = vperm.xlu1 %2119, %v511_v23   ;;  %664 = vperm.xlu0 %2118, %v510_v24   ;;  %v227_v23 = vld [vmem:[%s2334_s4 + $0x58] sm:$0xff]  ;;  %v226_v24 = vld [vmem:[%s2334_s4 + $0x50] sm:$0xff] }
  0x4a   : > { %679 = vperm.xlu1 %2119, %v513_v25   ;;  %674 = vperm.xlu0 %2118, %v512_v26  }
  0x4e   : > { %689 = vperm.xlu1 %2119, %v515_v27   ;;  %684 = vperm.xlu0 %2118, %v514_v28   ;;  %v229_v27 = vld [vmem:[%s2334_s4 + $0x68] sm:$0xff]  ;;  %v228_v28 = vld [vmem:[%s2334_s4 + $0x60] sm:$0xff] }
  0x52   : > { %699 = vperm.xlu1 %2119, %v517_v29   ;;  %694 = vperm.xlu0 %2118, %v516_v30  }
  0x56   : > { %709 = vperm.xlu1 %2119, %v519_v31   ;;  %704 = vperm.xlu0 %2118, %v518_v32   ;;  %v231_v31 = vld [vmem:[%s2334_s4 + $0x78] sm:$0xff]  ;;  %v230_v32 = vld [vmem:[%s2334_s4 + $0x70] sm:$0xff] }
  0x5a   : > { %719 = vperm.xlu1 %2119, %v521_v33   ;;  %714 = vperm.xlu0 %2118, %v520_v34  }
  0x5e   : > { %729 = vperm.xlu1 %2119, %v523_v35   ;;  %724 = vperm.xlu0 %2118, %v522_v36   ;;  %v233_v35 = vld [vmem:[%s2334_s4 + $0x88] sm:$0xff]  ;;  %v232_v36 = vld [vmem:[%s2334_s4 + $0x80] sm:$0xff] }
  0x62   : > { %739 = vperm.xlu1 %2119, %v525_v37   ;;  %734 = vperm.xlu0 %2118, %v524_v38  }
  0x66   : > { %749 = vperm.xlu1 %2119, %v527_v39   ;;  %744 = vperm.xlu0 %2118, %v526_v40   ;;  %v235_v39 = vld [vmem:[%s2334_s4 + $0x98] sm:$0xff]  ;;  %v234_v40 = vld [vmem:[%s2334_s4 + $0x90] sm:$0xff] }
  0x6a   : > { %759 = vperm.xlu1 %2119, %v529_v41   ;;  %754 = vperm.xlu0 %2118, %v528_v42  }
  0x6e   : > { %769 = vperm.xlu1 %2119, %v531_v43   ;;  %764 = vperm.xlu0 %2118, %v530_v44   ;;  %v237_v43 = vld [vmem:[%s2334_s4 + $0xa8] sm:$0xff]  ;;  %v236_v44 = vld [vmem:[%s2334_s4 + $0xa0] sm:$0xff] }
  0x72   : > { %779 = vperm.xlu1 %2119, %v533_v45   ;;  %774 = vperm.xlu0 %2118, %v532_v46  }
  0x76   : > { %789 = vperm.xlu1 %2119, %v535_v47   ;;  %784 = vperm.xlu0 %2118, %v534_v48   ;;  %v239_v47 = vld [vmem:[%s2334_s4 + $0xb8] sm:$0xff]  ;;  %v238_v48 = vld [vmem:[%s2334_s4 + $0xb0] sm:$0xff] }
  0x7a   : > { %799 = vperm.xlu1 %2119, %v537_v49   ;;  %794 = vperm.xlu0 %2118, %v536_v50  }
  0x7e   : > { %809 = vperm.xlu1 %2119, %v539_v51   ;;  %804 = vperm.xlu0 %2118, %v538_v52   ;;  %v241_v51 = vld [vmem:[%s2334_s4 + $0xc8] sm:$0xff]  ;;  %v240_v52 = vld [vmem:[%s2334_s4 + $0xc0] sm:$0xff] }
  0x82   : > { %819 = vperm.xlu1 %2119, %v541_v53   ;;  %814 = vperm.xlu0 %2118, %v540_v54  }
  0x86   : > { %829 = vperm.xlu1 %2119, %v543_v55   ;;  %824 = vperm.xlu0 %2118, %v542_v56   ;;  %v243_v55 = vld [vmem:[%s2334_s4 + $0xd8] sm:$0xff]  ;;  %v242_v56 = vld [vmem:[%s2334_s4 + $0xd0] sm:$0xff] }
  0x8a   : > { %839 = vperm.xlu1 %2119, %v545_v57   ;;  %834 = vperm.xlu0 %2118, %v544_v58  }
  0x8e   : > { %849 = vperm.xlu1 %2119, %v547_v59   ;;  %844 = vperm.xlu0 %2118, %v546_v60   ;;  %v245_v59 = vld [vmem:[%s2334_s4 + $0xe8] sm:$0xff]  ;;  %v244_v60 = vld [vmem:[%s2334_s4 + $0xe0] sm:$0xff] }
  0x92   : > { %859 = vperm.xlu1 %2119, %v549_v61   ;;  %854 = vperm.xlu0 %2118, %v548_v62  }
  0x95   : > { %v2336_v1 = vpop.permute.xlu1 %564  ;;  %v2338_v2 = vpop.permute.xlu0 %554 }
  0x96   : > { %869 = vperm.xlu1 %2119, %v551_v63   ;;  %864 = vperm.xlu0 %2118, %v550_v0   ;;  %v247_v63 = vld [vmem:[%s2334_s4 + $0xf8] sm:$0xff]  ;;  %v246_v0 = vld [vmem:[%s2334_s4 + $0xf0] sm:$0xff] }
  0x99   : > { %v2342_v5 = vpop.permute.xlu1 %569  ;;  %v2344_v6 = vpop.permute.xlu0 %559 }
  0x9a   : > { %943 = vperm.xlu1 %2119, %v217_v3   ;;  %938 = vperm.xlu0 %2118, %v216_v4  }
  0x9d   : > { %v2348_v9 = vpop.permute.xlu1 %579  ;;  %v2350_v10 = vpop.permute.xlu0 %574 }
  0x9e   : > { %953 = vperm.xlu1 %2119, %v219_v7   ;;  %948 = vperm.xlu0 %2118, %v218_v8   ;;  %v249_v7 = vld [vmem:[%s2334_s4 + $0x108] sm:$0xff]  ;;  %v248_v8 = vld [vmem:[%s2334_s4 + $0x100] sm:$0xff] }
  0xa1   : > { %v2354_v13 = vpop.permute.xlu1 %589  ;;  %v2356_v14 = vpop.permute.xlu0 %584 }
  0xa2   : > { %963 = vperm.xlu1 %2119, %v221_v11   ;;  %958 = vperm.xlu0 %2118, %v220_v12  }
  0xa5   : > { %v2360_v17 = vpop.permute.xlu1 %599  ;;  %v2362_v18 = vpop.permute.xlu0 %594 }
  0xa6   : > { %973 = vperm.xlu1 %2119, %v223_v15   ;;  %968 = vperm.xlu0 %2118, %v222_v16   ;;  %v251_v15 = vld [vmem:[%s2334_s4 + $0x118] sm:$0xff]  ;;  %v250_v16 = vld [vmem:[%s2334_s4 + $0x110] sm:$0xff] }
  0xa9   : > { %v2366_v21 = vpop.permute.xlu1 %609  ;;  %v2368_v22 = vpop.permute.xlu0 %604 }
  0xaa   : > { %983 = vperm.xlu1 %2119, %v225_v19   ;;  %978 = vperm.xlu0 %2118, %v224_v20  }
  0xad   : > { %v2372_v25 = vpop.permute.xlu1 %619  ;;  %v2374_v26 = vpop.permute.xlu0 %614 }
  0xae   : > { %993 = vperm.xlu1 %2119, %v227_v23   ;;  %988 = vperm.xlu0 %2118, %v226_v24   ;;  %v253_v23 = vld [vmem:[%s2334_s4 + $0x128] sm:$0xff]  ;;  %v252_v24 = vld [vmem:[%s2334_s4 + $0x120] sm:$0xff] }
  0xb1   : > { %v2378_v29 = vpop.permute.xlu1 %629  ;;  %v2380_v30 = vpop.permute.xlu0 %624 }
  0xb2   : > { %1003 = vperm.xlu1 %2119, %v229_v27   ;;  %998 = vperm.xlu0 %2118, %v228_v28  }
  0xb5   : > { %v2384_v33 = vpop.permute.xlu1 %639  ;;  %v2386_v34 = vpop.permute.xlu0 %634 }
  0xb6   : > { %1013 = vperm.xlu1 %2119, %v231_v31   ;;  %1008 = vperm.xlu0 %2118, %v230_v32   ;;  %v255_v31 = vld [vmem:[%s2334_s4 + $0x138] sm:$0xff]  ;;  %v254_v32 = vld [vmem:[%s2334_s4 + $0x130] sm:$0xff] }
  0xb9   : > { %v2390_v37 = vpop.permute.xlu1 %649  ;;  %v2392_v38 = vpop.permute.xlu0 %644 }
  0xba   : > { %1023 = vperm.xlu1 %2119, %v233_v35   ;;  %1018 = vperm.xlu0 %2118, %v232_v36  }
  0xbd   : > { %v2396_v41 = vpop.permute.xlu1 %659  ;;  %v2398_v42 = vpop.permute.xlu0 %654 }
  0xbe   : > { %1033 = vperm.xlu1 %2119, %v235_v39   ;;  %1028 = vperm.xlu0 %2118, %v234_v40   ;;  %v257_v39 = vld [vmem:[%s2334_s4 + $0x148] sm:$0xff]  ;;  %v256_v40 = vld [vmem:[%s2334_s4 + $0x140] sm:$0xff] }
  0xc1   : > { %v2402_v45 = vpop.permute.xlu1 %669  ;;  %v2404_v46 = vpop.permute.xlu0 %664 }
  0xc2   : > { %1043 = vperm.xlu1 %2119, %v237_v43   ;;  %1038 = vperm.xlu0 %2118, %v236_v44  }
  0xc5   : > { %v2408_v49 = vpop.permute.xlu1 %679  ;;  %v2410_v50 = vpop.permute.xlu0 %674 }
  0xc6   : > { %1053 = vperm.xlu1 %2119, %v239_v47   ;;  %1048 = vperm.xlu0 %2118, %v238_v48   ;;  %v259_v47 = vld [vmem:[%s2334_s4 + $0x158] sm:$0xff]  ;;  %v258_v48 = vld [vmem:[%s2334_s4 + $0x150] sm:$0xff] }
  0xc9   : > { %v2414_v53 = vpop.permute.xlu1 %689  ;;  %v2416_v54 = vpop.permute.xlu0 %684 }
  0xca   : > { %1063 = vperm.xlu1 %2119, %v241_v51   ;;  %1058 = vperm.xlu0 %2118, %v240_v52  }
  0xcd   : > { %v2420_v57 = vpop.permute.xlu1 %699  ;;  %v2422_v58 = vpop.permute.xlu0 %694 }
  0xce   : > { %1073 = vperm.xlu1 %2119, %v243_v55   ;;  %1068 = vperm.xlu0 %2118, %v242_v56   ;;  %v261_v55 = vld [vmem:[%s2334_s4 + $0x168] sm:$0xff]  ;;  %v260_v56 = vld [vmem:[%s2334_s4 + $0x160] sm:$0xff] }
  0xd1   : > { %v2426_v61 = vpop.permute.xlu1 %709  ;;  %v2428_v62 = vpop.permute.xlu0 %704 }
  0xd2   : > { %1083 = vperm.xlu1 %2119, %v245_v59   ;;  %1078 = vperm.xlu0 %2118, %v244_v60  }
  0xd5   : > { %v2432_v3 = vpop.permute.xlu1 %719  ;;  %v2434_v4 = vpop.permute.xlu0 %714 }
  0xd6   : > { %1093 = vperm.xlu1 %2119, %v247_v63   ;;  %1088 = vperm.xlu0 %2118, %v246_v0   ;;  %v263_v63 = vld [vmem:[%s2334_s4 + $0x178] sm:$0xff]  ;;  %v262_v0 = vld [vmem:[%s2334_s4 + $0x170] sm:$0xff] }
  0xd9   : > { %v2438_v11 = vpop.permute.xlu1 %729  ;;  %v2440_v12 = vpop.permute.xlu0 %724 }
  0xda   : > { %1103 = vperm.xlu1 %2119, %v249_v7   ;;  %1098 = vperm.xlu0 %2118, %v248_v8  }
  0xdd   : > { %v2444_v19 = vpop.permute.xlu1 %739  ;;  %v2446_v20 = vpop.permute.xlu0 %734 }
  0xde   : > { %1113 = vperm.xlu1 %2119, %v251_v15   ;;  %1108 = vperm.xlu0 %2118, %v250_v16   ;;  %v265_v15 = vld [vmem:[%s2334_s4 + $0x188] sm:$0xff]  ;;  %v264_v16 = vld [vmem:[%s2334_s4 + $0x180] sm:$0xff] }
  0xe1   : > { %v2450_v27 = vpop.permute.xlu1 %749  ;;  %v2452_v28 = vpop.permute.xlu0 %744 }
  0xe2   : > { %2708 = vst [vmem:[#allocation5_spill] sm:$0xff] %v2452_v28  ;;  %1123 = vperm.xlu1 %2119, %v253_v23   ;;  %1118 = vperm.xlu0 %2118, %v252_v24  }
  0xe5   : > { %v2456_v35 = vpop.permute.xlu1 %759  ;;  %v2458_v36 = vpop.permute.xlu0 %754 }
  0xe6   : > { %2709 = vst [vmem:[#allocation6_spill] sm:$0xff] %v2456_v35  ;;  %2710 = vst [vmem:[#allocation7_spill] sm:$0xff] %v2458_v36  ;;  %1133 = vperm.xlu1 %2119, %v255_v31   ;;  %1128 = vperm.xlu0 %2118, %v254_v32   ;;  %v267_v31 = vld [vmem:[%s2334_s4 + $0x198] sm:$0xff]  ;;  %v266_v32 = vld [vmem:[%s2334_s4 + $0x190] sm:$0xff] }
  0xe9   : > { %v2462_v43 = vpop.permute.xlu1 %769  ;;  %v2464_v44 = vpop.permute.xlu0 %764 }
  0xea   : > { %2711 = vst [vmem:[#allocation8_spill] sm:$0xff] %v2462_v43  ;;  %2712 = vst [vmem:[#allocation9_spill] sm:$0xff] %v2464_v44  ;;  %1143 = vperm.xlu1 %2119, %v257_v39   ;;  %1138 = vperm.xlu0 %2118, %v256_v40   ;;  %v282_v43 = vld [vmem:[%s2506_s9 + $0x10] sm:$0xff] }
  0xeb   : > { %v307_v28 = vunpack.c.3.s8 %v282_v43 }
  0xed   : > { %v2468_v51 = vpop.permute.xlu1 %779  ;;  %v2470_v52 = vpop.permute.xlu0 %774 }
  0xee   : > { %2713 = vst [vmem:[#allocation10_spill] sm:$0xff] %v2468_v51  ;;  %2714 = vst [vmem:[#allocation11_spill] sm:$0xff] %v2470_v52  ;;  %1153 = vperm.xlu1 %2119, %v259_v47   ;;  %1148 = vperm.xlu0 %2118, %v258_v48   ;;  %v269_v47 = vld [vmem:[%s2334_s4 + $0x1a8] sm:$0xff]  ;;  %v268_v48 = vld [vmem:[%s2334_s4 + $0x1a0] sm:$0xff] }
  0xef   : > { %v278_v51 = vld [vmem:[%s2334_s4 + $0x1f0] sm:$0xff] }
  0xf1   : > { %v2474_v59 = vpop.permute.xlu1 %789  ;;  %v2476_v60 = vpop.permute.xlu0 %784 }
  0xf2   : > { %2715 = vst [vmem:[#allocation12_spill] sm:$0xff] %v2474_v59  ;;  %2716 = vst [vmem:[#allocation13_spill] sm:$0xff] %v2476_v60  ;;  %1163 = vperm.xlu1 %2119, %v261_v55   ;;  %1158 = vperm.xlu0 %2118, %v260_v56  }
  0xf5   : > { %v2481_v7 = vpop.permute.xlu1 %799  ;;  %v2483_v8 = vpop.permute.xlu0 %794 }
  0xf6   : > { %2717 = vst [vmem:[#allocation14_spill] sm:$0xff] %v2481_v7  ;;  %2718 = vst [vmem:[#allocation15_spill] sm:$0xff] %v2483_v8  ;;  %1173 = vperm.xlu1 %2119, %v263_v63   ;;  %1168 = vperm.xlu0 %2118, %v262_v0   ;;  %v271_v63 = vld [vmem:[%s2334_s4 + $0x1b8] sm:$0xff]  ;;  %v270_v0 = vld [vmem:[%s2334_s4 + $0x1b0] sm:$0xff] }
  0xf9   : > { %v2487_v23 = vpop.permute.xlu1 %809  ;;  %v2489_v24 = vpop.permute.xlu0 %804 }
  0xfa   : > { %2719 = vst [vmem:[#allocation16_spill] sm:$0xff] %v2487_v23  ;;  %2720 = vst [vmem:[#allocation17_spill] sm:$0xff] %v2489_v24  ;;  %1183 = vperm.xlu1 %2119, %v265_v15   ;;  %1178 = vperm.xlu0 %2118, %v264_v16   ;;  %v280_v15 = vld [vmem:[%s2506_s9] sm:$0xff]  ;;  %v275_v24 = vld [vmem:[%s2334_s4 + $0x1d8] sm:$0xff] }
  0xfd   : > { %v2493_v39 = vpop.permute.xlu1 %819  ;;  %v2495_v40 = vpop.permute.xlu0 %814 }
  0xfe   : > { %2721 = vst [vmem:[#allocation18_spill] sm:$0xff] %v2493_v39  ;;  %2722 = vst [vmem:[#allocation19_spill] sm:$0xff] %v2495_v40  ;;  %1193 = vperm.xlu1 %2119, %v267_v31   ;;  %1188 = vperm.xlu0 %2118, %v266_v32   ;;  %v273_v32 = vld [vmem:[%s2334_s4 + $0x1c8] sm:$0xff]  ;;  %v297_v40 = vunpack.c.1.s8 %v280_v15 }
 0x101   : > { %v2499_v55 = vpop.permute.xlu1 %829  ;;  %v2501_v56 = vpop.permute.xlu0 %824 }
 0x102   : > { %2723 = vst [vmem:[#allocation20_spill] sm:$0xff] %v2499_v55  ;;  %2724 = vst [vmem:[#allocation21_spill] sm:$0xff] %v2501_v56  ;;  %1203 = vperm.xlu1 %2119, %v269_v47   ;;  %1198 = vperm.xlu0 %2118, %v268_v48   ;;  %v272_v56 = vld [vmem:[%s2334_s4 + $0x1c0] sm:$0xff]  ;;  %v296_v55 = vunpack.c.0.s8 %v280_v15  ;;  %v298_v48 = vunpack.c.2.s8 %v280_v15 }
 0x104   : > { %v360_v23 = vand.u32 255, %v296_v55 }
 0x105   : > { %v2511_v16 = vpop.permute.xlu1 %839  ;;  %v2513_v31 = vpop.permute.xlu0 %834 }
 0x106   : > { %2725 = vst [vmem:[#allocation22_spill] sm:$0xff] %v2511_v16  ;;  %2726 = vst [vmem:[#allocation23_spill] sm:$0xff] %v2513_v31  ;;  %1213 = vperm.xlu1 %2119, %v271_v63   ;;  %1208 = vperm.xlu0 %2118, %v270_v0   ;;  %v274_v16 = vld [vmem:[%s2334_s4 + $0x1d0] sm:$0xff]  ;;  %v299_v31 = vunpack.c.3.s8 %v280_v15  ;;  %v361_v63 = vand.u32 255, %v297_v40  ;;  %v281_v0 = vld [vmem:[%s2506_s9 + $0x8] sm:$0xff]  ;;  %v424_v60 = vcvt.s32.f32 %v360_v23 }
 0x107   : > { %v300_v55 = vunpack.c.0.s8 %v281_v0 }
 0x108   : > { %v363_v59 = vand.u32 255, %v299_v31  ;;  %v425_v52 = vcvt.s32.f32 %v361_v63  ;;  %v872_v23 = vmul.f32 %v2338_v2, %v424_v60 }
 0x109   : > { %v2517_v39 = vpop.permute.xlu1 %849  ;;  %v2519_v47 = vpop.permute.xlu0 %844  ;;  %v364_v44 = vand.u32 255, %v300_v55 }
 0x10a   : > { %2727 = vst [vmem:[#allocation24_spill] sm:$0xff] %v2517_v39  ;;  %2728 = vst [vmem:[#allocation25_spill] sm:$0xff] %v2519_v47  ;;  %1223 = vperm.xlu1 %2119, %v273_v32   ;;  %1218 = vperm.xlu0 %2118, %v272_v56   ;;  %v362_v39 = vand.u32 255, %v298_v48  ;;  %v301_v47 = vunpack.c.1.s8 %v281_v0  ;;  %v277_v32 = vld [vmem:[%s2334_s4 + $0x1e8] sm:$0xff]  ;;  %v276_v56 = vld [vmem:[%s2334_s4 + $0x1e0] sm:$0xff]  ;;  %v302_v48 = vunpack.c.2.s8 %v281_v0  ;;  %v427_v31 = vcvt.s32.f32 %v363_v59 }
 0x10b   : > { %v873_v63 = vmul.f32 %v2344_v6, %v425_v52  ;;  %v428_v6 = vcvt.s32.f32 %v364_v44 }
 0x10c   : > { %v875_v59 = vmul.f32 %v2342_v5, %v427_v31  ;;  %v371_v31 = vand.u32 255, %v307_v28 }
 0x10d   : > { %v2524_v8 = vpop.permute.xlu1 %859  ;;  %v2526_v7 = vpop.permute.xlu0 %854  ;;  %v876_v5 = vmul.f32 %v2350_v10, %v428_v6 }
 0x10e   : > { %2729 = vst [vmem:[#allocation26_spill] sm:$0xff] %v2524_v8  ;;  %2730 = vst [vmem:[#allocation27_spill] sm:$0xff] %v2526_v7  ;;  %1233 = vperm.xlu1 %2119, %v275_v24   ;;  %1228 = vperm.xlu0 %2118, %v274_v16   ;;  %v303_v7 = vunpack.c.3.s8 %v281_v0  ;;  %v426_v24 = vcvt.s32.f32 %v362_v39  ;;  %v365_v16 = vand.u32 255, %v301_v47  ;;  %v279_v8 = vld [vmem:[%s2334_s4 + $0x1f8] sm:$0xff]  ;;  %v366_v47 = vand.u32 255, %v302_v48 }
 0x10f   : > { %v305_v0 = vunpack.c.1.s8 %v282_v43 }
 0x110   : > { %v367_v36 = vand.u32 255, %v303_v7  ;;  %v429_v39 = vcvt.s32.f32 %v365_v16  ;;  %v874_v2 = vmul.f32 %v2336_v1, %v426_v24  ;;  %v306_v16 = vunpack.c.2.s8 %v282_v43 }
 0x111   : > { %v2530_v40 = vpop.permute.xlu1 %869  ;;  %v2532_v15 = vpop.permute.xlu0 %864 }
 0x112   : > { %2731 = vst [vmem:[#allocation28_spill] sm:$0xff] %v2530_v40  ;;  %2732 = vst [vmem:[#allocation29_spill] sm:$0xff] %v2532_v15  ;;  %1243 = vperm.xlu1 %2119, %v277_v32   ;;  %1238 = vperm.xlu0 %2118, %v276_v56   ;;  %v304_v56 = vunpack.c.0.s8 %v282_v43  ;;  %v877_v1 = vmul.f32 %v2348_v9, %v429_v39 }
 0x114   : > { %v368_v44 = vand.u32 255, %v304_v56 }
 0x115   : > { %v944_v40 = vpop.permute.xlu1 %943  ;;  %v939_v15 = vpop.permute.xlu0 %938 }
 0x116   : > { %v1257_v35 = vadd.f32 %v944_v40, %v873_v63  ;;  %v1256_v32 = vadd.f32 %v939_v15, %v872_v23  ;;  %1253 = vperm.xlu1 %2119, %v279_v8   ;;  %1248 = vperm.xlu0 %2118, %v278_v51   ;;  %v431_v8 = vcvt.s32.f32 %v367_v36  ;;  %v430_v40 = vcvt.s32.f32 %v366_v47 }
 0x117   : > { %v369_v15 = vand.u32 255, %v305_v0  ;;  %v432_v10 = vcvt.s32.f32 %v368_v44 }
 0x118   : > { %v1888_v52 = vpack.c.bf16 %v1257_v35, %v1256_v32  ;;  %v283_v35 = vld [vmem:[%s2506_s9 + $0x18] sm:$0xff]  ;;  %v879_v43 = vmul.f32 %v2354_v13, %v431_v8  ;;  %v878_v9 = vmul.f32 %v2356_v14, %v430_v40  ;;  %v284_v14 = vld [vmem:[%s2506_s9 + $0x20] sm:$0xff] }
 0x119   : > { %v954_v60 = vpop.permute.xlu1 %953  ;;  %v949_v55 = vpop.permute.xlu0 %948  ;;  %v309_v36 = vunpack.c.1.s8 %v283_v35  ;;  %v308_v47 = vunpack.c.0.s8 %v283_v35  ;;  %v311_v6 = vunpack.c.3.s8 %v283_v35  ;;  %v880_v13 = vmul.f32 %v2362_v18, %v432_v10 }
 0x11a   : > { %1889 = vst [vmem:[%s2544_s17] sm:$0xff] %v1888_v52   ;;  %v1259_v51 = vadd.f32 %v954_v60, %v875_v59  ;;  %v1258_v7 = vadd.f32 %v949_v55, %v874_v2  ;;  %v433_v59 = vcvt.s32.f32 %v369_v15  ;;  %v370_v2 = vand.u32 255, %v306_v16 }
 0x11b   : > { %v435_v60 = vcvt.s32.f32 %v371_v31  ;;  %v372_v8 = vand.u32 255, %v308_v47  ;;  %v313_v31 = vunpack.c.1.s8 %v284_v14 }
 0x11c   : > { %v1893_v24 = vpack.c.bf16 %v1259_v51, %v1258_v7  ;;  %v434_v55 = vcvt.s32.f32 %v370_v2  ;;  %v373_v51 = vand.u32 255, %v309_v36  ;;  %v310_v7 = vunpack.c.2.s8 %v283_v35 }
 0x11d   : > { %v964_v48 = vpop.permute.xlu1 %963  ;;  %v959_v23 = vpop.permute.xlu0 %958  ;;  %v881_v15 = vmul.f32 %v2360_v17, %v433_v59  ;;  %v883_v35 = vmul.f32 %v2366_v21, %v435_v60  ;;  %v436_v18 = vcvt.s32.f32 %v372_v8  ;;  %v315_v36 = vunpack.c.3.s8 %v284_v14 }
 0x11e   : > { %2045 = vst [vmem:[%s2544_s17 + $0x8] sm:$0xff] %v1893_v24   ;;  %v1261_v63 = vadd.f32 %v964_v48, %v877_v1  ;;  %v1260_v32 = vadd.f32 %v959_v23, %v876_v5  ;;  %v375_v5 = vand.u32 255, %v311_v6  ;;  %v437_v48 = vcvt.s32.f32 %v373_v51 }
 0x11f   : > { %v374_v23 = vand.u32 255, %v310_v7  ;;  %v882_v17 = vmul.f32 %v2368_v22, %v434_v55  ;;  %v884_v21 = vmul.f32 %v2374_v26, %v436_v18  ;;  %v285_v22 = vld [vmem:[%s2506_s9 + $0x28] sm:$0xff]  ;;  %v379_v55 = vand.u32 255, %v315_v36 }
 0x120   : > { %v1898_v39 = vpack.c.bf16 %v1261_v63, %v1260_v32  ;;  %v312_v63 = vunpack.c.0.s8 %v284_v14  ;;  %v317_v8 = vunpack.c.1.s8 %v285_v22 }
 0x121   : > { %v974_v0 = vpop.permute.xlu1 %973  ;;  %v969_v56 = vpop.permute.xlu0 %968  ;;  %v438_v10 = vcvt.s32.f32 %v374_v23  ;;  %v443_v23 = vcvt.s32.f32 %v379_v55 }
 0x122   : > { %2046 = vst [vmem:[%s2544_s17 + $0x10] sm:$0xff] %v1898_v39   ;;  %v1263_v28 = vadd.f32 %v974_v0, %v879_v43  ;;  %v1262_v52 = vadd.f32 %v969_v56, %v878_v9  ;;  %v439_v9 = vcvt.s32.f32 %v375_v5  ;;  %v377_v39 = vand.u32 255, %v313_v31 }
 0x123   : > { %v314_v0 = vunpack.c.2.s8 %v284_v14  ;;  %v885_v56 = vmul.f32 %v2372_v25, %v437_v48  ;;  %v376_v6 = vand.u32 255, %v312_v63  ;;  %v886_v25 = vmul.f32 %v2380_v30, %v438_v10  ;;  %v286_v30 = vld [vmem:[%s2506_s9 + $0x30] sm:$0xff] }
 0x124   : > { %v1903_v40 = vpack.c.bf16 %v1263_v28, %v1262_v52  ;;  %v887_v14 = vmul.f32 %v2378_v29, %v439_v9  ;;  %v381_v63 = vand.u32 255, %v317_v8 }
 0x125   : > { %v984_v16 = vpop.permute.xlu1 %983  ;;  %v979_v1 = vpop.permute.xlu0 %978  ;;  %v440_v26 = vcvt.s32.f32 %v376_v6 }
 0x126   : > { %2047 = vst [vmem:[%s2544_s17 + $0x18] sm:$0xff] %v1903_v40   ;;  %v1265_v44 = vadd.f32 %v984_v16, %v881_v15  ;;  %v1264_v24 = vadd.f32 %v979_v1, %v880_v13  ;;  %v441_v15 = vcvt.s32.f32 %v377_v39  ;;  %v378_v13 = vand.u32 255, %v314_v0 }
 0x127   : > { %v316_v40 = vunpack.c.0.s8 %v285_v22  ;;  %v888_v29 = vmul.f32 %v2386_v34, %v440_v26  ;;  %v445_v9 = vcvt.s32.f32 %v381_v63  ;;  %v321_v39 = vunpack.c.1.s8 %v286_v30 }
 0x128   : > { %v1908_v32 = vpack.c.bf16 %v1265_v44, %v1264_v24  ;;  %v319_v44 = vunpack.c.3.s8 %v285_v22  ;;  %v442_v31 = vcvt.s32.f32 %v378_v13  ;;  %v320_v0 = vunpack.c.0.s8 %v286_v30  ;;  %v287_v13 = vld [vmem:[%s2506_s9 + $0x38] sm:$0xff] }
 0x129   : > { %v994_v59 = vpop.permute.xlu1 %993  ;;  %v989_v2 = vpop.permute.xlu0 %988  ;;  %v380_v18 = vand.u32 255, %v316_v40  ;;  %v893_v8 = vmul.f32 %v2396_v41, %v445_v9  ;;  %v322_v40 = vunpack.c.2.s8 %v286_v30  ;;  %v325_v26 = vunpack.c.1.s8 %v287_v13 }
 0x12a   : > { %2048 = vst [vmem:[%s2544_s17 + $0x20] sm:$0xff] %v1908_v32   ;;  %v1267_v47 = vadd.f32 %v994_v59, %v883_v35  ;;  %v1266_v43 = vadd.f32 %v989_v2, %v882_v17  ;;  %v318_v35 = vunpack.c.2.s8 %v285_v22  ;;  %v889_v17 = vmul.f32 %v2384_v33, %v441_v15 }
 0x12b   : > { %v383_v36 = vand.u32 255, %v319_v44  ;;  %v890_v33 = vmul.f32 %v2392_v38, %v442_v31  ;;  %v444_v34 = vcvt.s32.f32 %v380_v18  ;;  %v323_v15 = vunpack.c.3.s8 %v286_v30 }
 0x12c   : > { %v1913_v28 = vpack.c.bf16 %v1267_v47, %v1266_v43  ;;  %v382_v10 = vand.u32 255, %v318_v35  ;;  %v386_v41 = vand.u32 255, %v322_v40 }
 0x12d   : > { %v1004_v52 = vpop.permute.xlu1 %1003  ;;  %v999_v60 = vpop.permute.xlu0 %998 }
 0x12e   : > { %2049 = vst [vmem:[%s2544_s17 + $0x28] sm:$0xff] %v1913_v28   ;;  %v1269_v51 = vadd.f32 %v1004_v52, %v885_v56  ;;  %v1268_v7 = vadd.f32 %v999_v60, %v884_v21  ;;  %v891_v56 = vmul.f32 %v2390_v37, %v443_v23  ;;  %v447_v28 = vcvt.s32.f32 %v383_v36 }
 0x12f   : > { %v446_v55 = vcvt.s32.f32 %v382_v10  ;;  %v892_v37 = vmul.f32 %v2398_v42, %v444_v34 }
 0x130   : > { %v1918_v16 = vpack.c.bf16 %v1269_v51, %v1268_v7  ;;  %v385_v51 = vand.u32 255, %v321_v39  ;;  %v384_v7 = vand.u32 255, %v320_v0  ;;  %v895_v23 = vmul.f32 %v2402_v45, %v447_v28 }
 0x131   : > { %v1014_v1 = vpop.permute.xlu1 %1013  ;;  %v1009_v5 = vpop.permute.xlu0 %1008  ;;  %v894_v31 = vmul.f32 %v2404_v46, %v446_v55  ;;  %v288_v46 = vld [vmem:[%s2506_s9 + $0x40] sm:$0xff] }
 0x132   : > { %2050 = vst [vmem:[%s2544_s17 + $0x30] sm:$0xff] %v1918_v16   ;;  %v1271_v24 = vadd.f32 %v1014_v1, %v887_v14  ;;  %v1270_v48 = vadd.f32 %v1009_v5, %v886_v25  ;;  %v449_v5 = vcvt.s32.f32 %v385_v51  ;;  %v448_v44 = vcvt.s32.f32 %v384_v7 }
 0x133   : > { %v331_v55 = vunpack.c.3.s8 %v288_v46 }
 0x134   : > { %v1923_v32 = vpack.c.bf16 %v1271_v24, %v1270_v48  ;;  %v387_v24 = vand.u32 255, %v323_v15  ;;  %v324_v48 = vunpack.c.0.s8 %v287_v13  ;;  %v897_v36 = vmul.f32 %v2408_v49, %v449_v5 }
 0x135   : > { %v1024_v59 = vpop.permute.xlu1 %1023  ;;  %v1019_v2 = vpop.permute.xlu0 %1018  ;;  %v896_v45 = vmul.f32 %v2410_v50, %v448_v44  ;;  %v328_v50 = vunpack.c.0.s8 %v288_v46 }
 0x136   : > { %2051 = vst [vmem:[%s2544_s17 + $0x38] sm:$0xff] %v1923_v32   ;;  %v1273_v47 = vadd.f32 %v1024_v59, %v889_v17  ;;  %v1272_v43 = vadd.f32 %v1019_v2, %v888_v29  ;;  %v389_v17 = vand.u32 255, %v325_v26  ;;  %v451_v30 = vcvt.s32.f32 %v387_v24 }
 0x137   : > { %v388_v32 = vand.u32 255, %v324_v48  ;;  %v327_v59 = vunpack.c.3.s8 %v287_v13  ;;  %v326_v2 = vunpack.c.2.s8 %v287_v13 }
 0x138   : > { %v1928_v21 = vpack.c.bf16 %v1273_v47, %v1272_v43  ;;  %v450_v47 = vcvt.s32.f32 %v386_v41  ;;  %v453_v39 = vcvt.s32.f32 %v389_v17 }
 0x139   : > { %v1034_v6 = vpop.permute.xlu1 %1033  ;;  %v1029_v22 = vpop.permute.xlu0 %1028  ;;  %v391_v34 = vand.u32 255, %v327_v59 }
 0x13a   : > { %2052 = vst [vmem:[%s2544_s17 + $0x40] sm:$0xff] %v1928_v21   ;;  %v1275_v52 = vadd.f32 %v1034_v6, %v891_v56  ;;  %v1274_v60 = vadd.f32 %v1029_v22, %v890_v33  ;;  %v452_v33 = vcvt.s32.f32 %v388_v32  ;;  %v390_v21 = vand.u32 255, %v326_v2  ;;  %v290_v2 = vld [vmem:[%s2506_s9 + $0x50] sm:$0xff] }
 0x13b   : > { %v329_v6 = vunpack.c.1.s8 %v288_v46  ;;  %v899_v22 = vmul.f32 %v2414_v53, %v451_v30  ;;  %v898_v49 = vmul.f32 %v2416_v54, %v450_v47  ;;  %v455_v15 = vcvt.s32.f32 %v391_v34  ;;  %v289_v54 = vld [vmem:[%s2506_s9 + $0x48] sm:$0xff] }
 0x13c   : > { %v1933_v38 = vpack.c.bf16 %v1275_v52, %v1274_v60  ;;  %v454_v13 = vcvt.s32.f32 %v390_v21  ;;  %v901_v40 = vmul.f32 %v2420_v57, %v453_v39  ;;  %v900_v53 = vmul.f32 %v2422_v58, %v452_v33 }
 0x13d   : > { %v1044_v14 = vpop.permute.xlu1 %1043  ;;  %v1039_v25 = vpop.permute.xlu0 %1038  ;;  %v333_v48 = vunpack.c.1.s8 %v289_v54  ;;  %v335_v59 = vunpack.c.3.s8 %v289_v54  ;;  %v336_v33 = vunpack.c.0.s8 %v290_v2 }
 0x13e   : > { %2053 = vst [vmem:[%s2544_s17 + $0x48] sm:$0xff] %v1933_v38   ;;  %v1277_v16 = vadd.f32 %v1044_v14, %v893_v8  ;;  %v1276_v1 = vadd.f32 %v1039_v25, %v892_v37  ;;  %v393_v8 = vand.u32 255, %v329_v6  ;;  %v330_v37 = vunpack.c.2.s8 %v288_v46 }
 0x13f   : > { %v392_v38 = vand.u32 255, %v328_v50  ;;  %v902_v57 = vmul.f32 %v2428_v62, %v454_v13  ;;  %v397_v30 = vand.u32 255, %v333_v48 }
 0x140   : > { %v1938_v42 = vpack.c.bf16 %v1277_v16, %v1276_v1  ;;  %v395_v16 = vand.u32 255, %v331_v55  ;;  %v457_v44 = vcvt.s32.f32 %v393_v8  ;;  %v394_v24 = vand.u32 255, %v330_v37 }
 0x141   : > { %v1054_v63 = vpop.permute.xlu1 %1053  ;;  %v1049_v35 = vpop.permute.xlu0 %1048  ;;  %v456_v58 = vcvt.s32.f32 %v392_v38  ;;  %v461_v39 = vcvt.s32.f32 %v397_v30  ;;  %v339_v55 = vunpack.c.3.s8 %v290_v2 }
 0x142   : > { %2054 = vst [vmem:[%s2544_s17 + $0x50] sm:$0xff] %v1938_v42   ;;  %v1279_v29 = vadd.f32 %v1054_v63, %v895_v23  ;;  %v1278_v18 = vadd.f32 %v1049_v35, %v894_v31  ;;  %v332_v23 = vunpack.c.0.s8 %v289_v54  ;;  %v903_v31 = vmul.f32 %v2426_v61, %v455_v15 }
 0x143   : > { %v459_v35 = vcvt.s32.f32 %v395_v16  ;;  %v904_v61 = vmul.f32 %v2434_v4, %v456_v58 }
 0x144   : > { %v1943_v43 = vpack.c.bf16 %v1279_v29, %v1278_v18  ;;  %v458_v18 = vcvt.s32.f32 %v394_v24  ;;  %v396_v32 = vand.u32 255, %v332_v23 }
 0x145   : > { %v1064_v9 = vpop.permute.xlu1 %1063  ;;  %v1059_v10 = vpop.permute.xlu0 %1058  ;;  %v907_v34 = vmul.f32 %v2438_v11, %v459_v35 }
 0x146   : > { %2055 = vst [vmem:[%s2544_s17 + $0x58] sm:$0xff] %v1943_v43   ;;  %v1281_v0 = vadd.f32 %v1064_v9, %v897_v36  ;;  %v1280_v56 = vadd.f32 %v1059_v10, %v896_v45  ;;  %v905_v36 = vmul.f32 %v2432_v3, %v457_v44  ;;  %v334_v45 = vunpack.c.2.s8 %v289_v54 }
 0x147   : > { %v337_v43 = vunpack.c.1.s8 %v290_v2  ;;  %v906_v21 = vmul.f32 %v2440_v12, %v458_v18  ;;  %v291_v12 = vld [vmem:[%s2506_s9 + $0x58] sm:$0xff]  ;;  %v292_v18 = vld [vmem:[%s2506_s9 + $0x60] sm:$0xff] }
 0x148   : > { %v1948_v28 = vpack.c.bf16 %v1281_v0, %v1280_v56  ;;  %v460_v0 = vcvt.s32.f32 %v396_v32  ;;  %v399_v56 = vand.u32 255, %v335_v59  ;;  %v398_v3 = vand.u32 255, %v334_v45 }
 0x149   : > { %v1074_v52 = vpop.permute.xlu1 %1073  ;;  %v1069_v60 = vpop.permute.xlu0 %1068  ;;  %v343_v48 = vunpack.c.3.s8 %v291_v12 }
 0x14a   : > { %2056 = vst [vmem:[%s2544_s17 + $0x60] sm:$0xff] %v1948_v28   ;;  %v1283_v51 = vadd.f32 %v1074_v52, %v899_v22  ;;  %v1282_v7 = vadd.f32 %v1069_v60, %v898_v49  ;;  %v401_v49 = vand.u32 255, %v337_v43  ;;  %v463_v52 = vcvt.s32.f32 %v399_v56  ;;  %v2736_v43 = vld [vmem:[#allocation8_spill] sm:$0xff] }
 0x14b   : > { %v400_v60 = vand.u32 255, %v336_v33  ;;  %v908_v11 = vmul.f32 %v2446_v20, %v460_v0  ;;  %v462_v15 = vcvt.s32.f32 %v398_v3  ;;  %v340_v20 = vunpack.c.0.s8 %v291_v12 }
 0x14c   : > { %v1953_v14 = vpack.c.bf16 %v1283_v51, %v1282_v7  ;;  %v338_v51 = vunpack.c.2.s8 %v290_v2  ;;  %v909_v7 = vmul.f32 %v2444_v19, %v461_v39  ;;  %v911_v16 = vmul.f32 %v2450_v27, %v463_v52  ;;  %v2738_v52 = vld [vmem:[#allocation10_spill] sm:$0xff] }
 0x14d   : > { %v1084_v25 = vpop.permute.xlu1 %1083  ;;  %v1079_v26 = vpop.permute.xlu0 %1078  ;;  %v464_v54 = vcvt.s32.f32 %v400_v60  ;;  %v407_v2 = vand.u32 255, %v343_v48 }
 0x14e   : > { %2057 = vst [vmem:[%s2544_s17 + $0x68] sm:$0xff] %v1953_v14   ;;  %v1285_v1 = vadd.f32 %v1084_v25, %v901_v40  ;;  %v1284_v5 = vadd.f32 %v1079_v26, %v900_v53  ;;  %v465_v40 = vcvt.s32.f32 %v401_v49  ;;  %v403_v14 = vand.u32 255, %v339_v55  ;;  %v2739_v55 = vld [vmem:[#allocation11_spill] sm:$0xff] }
 0x14f   : > { %v402_v25 = vand.u32 255, %v338_v51  ;;  %v341_v26 = vunpack.c.1.s8 %v291_v12 }
 0x150   : > { %v1958_v41 = vpack.c.bf16 %v1285_v1, %v1284_v5  ;;  %v2733_v1 = vld [vmem:[#allocation5_spill] sm:$0xff] }
 0x151   : > { %v1094_v42 = vpop.permute.xlu1 %1093  ;;  %v1089_v63 = vpop.permute.xlu0 %1088  ;;  %v910_v19 = vmul.f32 %v2733_v1, %v462_v15  ;;  %v466_v58 = vcvt.s32.f32 %v402_v25 }
 0x152   : > { %2058 = vst [vmem:[%s2544_s17 + $0x70] sm:$0xff] %v1958_v41   ;;  %v1287_v17 = vadd.f32 %v1094_v42, %v903_v31  ;;  %v1286_v29 = vadd.f32 %v1089_v63, %v902_v57  ;;  %v467_v57 = vcvt.s32.f32 %v403_v14  ;;  %v405_v41 = vand.u32 255, %v341_v26  ;;  %v2734_v63 = vld [vmem:[#allocation6_spill] sm:$0xff]  ;;  %v2740_v14 = vld [vmem:[#allocation12_spill] sm:$0xff]  ;;  %v2741_v26 = vld [vmem:[#allocation13_spill] sm:$0xff] }
 0x153   : > { %v342_v42 = vunpack.c.2.s8 %v291_v12  ;;  %v913_v35 = vmul.f32 %v2734_v63, %v465_v40  ;;  %v2743_v63 = vld [vmem:[#allocation15_spill] sm:$0xff] }
 0x154   : > { %v1963_v62 = vpack.c.bf16 %v1287_v17, %v1286_v29  ;;  %v2735_v17 = vld [vmem:[#allocation7_spill] sm:$0xff]  ;;  %v404_v29 = vand.u32 255, %v340_v20  ;;  %v469_v45 = vcvt.s32.f32 %v405_v41  ;;  %v2742_v41 = vld [vmem:[#allocation14_spill] sm:$0xff] }
 0x155   : > { %v1104_v47 = vpop.permute.xlu1 %1103  ;;  %v1099_v46 = vpop.permute.xlu0 %1098  ;;  %v912_v27 = vmul.f32 %v2735_v17, %v464_v54 }
 0x156   : > { %2059 = vst [vmem:[%s2544_s17 + $0x78] sm:$0xff] %v1963_v62   ;;  %v1289_v9 = vadd.f32 %v1104_v47, %v905_v36  ;;  %v1288_v10 = vadd.f32 %v1099_v46, %v904_v61  ;;  %v406_v62 = vand.u32 255, %v342_v42  ;;  %v345_v47 = vunpack.c.1.s8 %v292_v18 }
 0x157   : > { %v344_v46 = vunpack.c.0.s8 %v292_v18  ;;  %v468_v0 = vcvt.s32.f32 %v404_v29  ;;  %v917_v60 = vmul.f32 %v2738_v52, %v469_v45 }
 0x158   : > { %v1968_v4 = vpack.c.bf16 %v1289_v9, %v1288_v10  ;;  %v915_v9 = vmul.f32 %v2736_v43, %v467_v57  ;;  %v2737_v10 = vld [vmem:[#allocation9_spill] sm:$0xff] }
 0x159   : > { %v1114_v6 = vpop.permute.xlu1 %1113  ;;  %v1109_v22 = vpop.permute.xlu0 %1108  ;;  %v914_v39 = vmul.f32 %v2737_v10, %v466_v58  ;;  %v408_v49 = vand.u32 255, %v344_v46  ;;  %v916_v51 = vmul.f32 %v2739_v55, %v468_v0  ;;  %v2745_v43 = vld [vmem:[#allocation17_spill] sm:$0xff]  ;;  %v295_v55 = vld [vmem:[%s2506_s9 + $0x78] sm:$0xff] }
 0x15a   : > { %2060 = vst [vmem:[%s2544_s17 + $0x80] sm:$0xff] %v1968_v4   ;;  %v1291_v50 = vadd.f32 %v1114_v6, %v907_v34  ;;  %v1290_v28 = vadd.f32 %v1109_v22, %v906_v21  ;;  %v471_v21 = vcvt.s32.f32 %v407_v2  ;;  %v470_v6 = vcvt.s32.f32 %v406_v62 }
 0x15b   : > { %v409_v22 = vand.u32 255, %v345_v47  ;;  %v2744_v47 = vld [vmem:[#allocation16_spill] sm:$0xff] }
 0x15c   : > { %v1973_v13 = vpack.c.bf16 %v1291_v50, %v1290_v28  ;;  %v347_v50 = vunpack.c.3.s8 %v292_v18  ;;  %v293_v28 = vld [vmem:[%s2506_s9 + $0x68] sm:$0xff]  ;;  %v919_v25 = vmul.f32 %v2740_v14, %v471_v21  ;;  %v2749_v14 = vld [vmem:[#allocation21_spill] sm:$0xff] }
 0x15d   : > { %v1124_v8 = vpop.permute.xlu1 %1123  ;;  %v1119_v37 = vpop.permute.xlu0 %1118  ;;  %v473_v40 = vcvt.s32.f32 %v409_v22  ;;  %v348_v54 = vunpack.c.0.s8 %v293_v28  ;;  %v351_v57 = vunpack.c.3.s8 %v293_v28  ;;  %v350_v58 = vunpack.c.2.s8 %v293_v28 }
 0x15e   : > { %2061 = vst [vmem:[%s2544_s17 + $0x88] sm:$0xff] %v1973_v13   ;;  %v1293_v53 = vadd.f32 %v1124_v8, %v909_v7  ;;  %v1292_v38 = vadd.f32 %v1119_v37, %v908_v11  ;;  %v346_v7 = vunpack.c.2.s8 %v292_v18  ;;  %v349_v13 = vunpack.c.1.s8 %v293_v28  ;;  %v2747_v28 = vld [vmem:[#allocation19_spill] sm:$0xff] }
 0x15f   : > { %v921_v42 = vmul.f32 %v2742_v41, %v473_v40  ;;  %v414_v45 = vand.u32 255, %v350_v58  ;;  %v357_v40 = vunpack.c.1.s8 %v295_v55  ;;  %v2751_v41 = vld [vmem:[#allocation23_spill] sm:$0xff] }
 0x160   : > { %v1978_v5 = vpack.c.bf16 %v1293_v53, %v1292_v38  ;;  %v472_v53 = vcvt.s32.f32 %v408_v49  ;;  %v411_v38 = vand.u32 255, %v347_v50  ;;  %v410_v1 = vand.u32 255, %v346_v7  ;;  %v2746_v49 = vld [vmem:[#allocation18_spill] sm:$0xff] }
 0x161   : > { %v1134_v44 = vpop.permute.xlu1 %1133  ;;  %v1129_v24 = vpop.permute.xlu0 %1128 }
 0x162   : > { %2062 = vst [vmem:[%s2544_s17 + $0x90] sm:$0xff] %v1978_v5   ;;  %v1295_v23 = vadd.f32 %v1134_v44, %v911_v16  ;;  %v1294_v31 = vadd.f32 %v1129_v24, %v910_v19  ;;  %v918_v16 = vmul.f32 %v2741_v26, %v470_v6  ;;  %v413_v44 = vand.u32 255, %v349_v13 }
 0x163   : > { %v474_v17 = vcvt.s32.f32 %v410_v1 }
 0x164   : > { %v1983_v30 = vpack.c.bf16 %v1295_v23, %v1294_v31  ;;  %v475_v23 = vcvt.s32.f32 %v411_v38  ;;  %v412_v31 = vand.u32 255, %v348_v54  ;;  %v2748_v38 = vld [vmem:[#allocation20_spill] sm:$0xff] }
 0x165   : > { %v1144_v32 = vpop.permute.xlu1 %1143  ;;  %v1139_v59 = vpop.permute.xlu0 %1138 }
 0x166   : > { %2063 = vst [vmem:[%s2544_s17 + $0x98] sm:$0xff] %v1983_v30   ;;  %v1297_v36 = vadd.f32 %v1144_v32, %v913_v35  ;;  %v1296_v61 = vadd.f32 %v1139_v59, %v912_v27  ;;  %v920_v35 = vmul.f32 %v2743_v63, %v472_v53  ;;  %v294_v27 = vld [vmem:[%s2506_s9 + $0x70] sm:$0xff]  ;;  %v477_v32 = vcvt.s32.f32 %v413_v44 }
 0x167   : > { %v353_v62 = vunpack.c.1.s8 %v294_v27  ;;  %v923_v46 = vmul.f32 %v2744_v47, %v475_v23  ;;  %v352_v10 = vunpack.c.0.s8 %v294_v27  ;;  %v354_v22 = vunpack.c.2.s8 %v294_v27 }
 0x168   : > { %v1988_v56 = vpack.c.bf16 %v1297_v36, %v1296_v61  ;;  %v476_v36 = vcvt.s32.f32 %v412_v31  ;;  %v415_v61 = vand.u32 255, %v351_v57  ;;  %v925_v50 = vmul.f32 %v2746_v49, %v477_v32  ;;  %v2750_v57 = vld [vmem:[#allocation22_spill] sm:$0xff] }
 0x169   : > { %v1154_v33 = vpop.permute.xlu1 %1153  ;;  %v1149_v34 = vpop.permute.xlu0 %1148  ;;  %v417_v6 = vand.u32 255, %v353_v62  ;;  %v356_v53 = vunpack.c.0.s8 %v295_v55  ;;  %v359_v31 = vunpack.c.3.s8 %v295_v55  ;;  %v358_v63 = vunpack.c.2.s8 %v295_v55 }
 0x16a   : > { %2064 = vst [vmem:[%s2544_s17 + $0xa0] sm:$0xff] %v1988_v56   ;;  %v1299_v3 = vadd.f32 %v1154_v33, %v915_v9  ;;  %v1298_v4 = vadd.f32 %v1149_v34, %v914_v39  ;;  %v922_v9 = vmul.f32 %v2745_v43, %v474_v17  ;;  %v355_v33 = vunpack.c.3.s8 %v294_v27 }
 0x16b   : > { %v924_v52 = vmul.f32 %v2747_v28, %v476_v36  ;;  %v420_v23 = vand.u32 255, %v356_v53  ;;  %v422_v62 = vand.u32 255, %v358_v63 }
 0x16c   : > { %v1993_v11 = vpack.c.bf16 %v1299_v3, %v1298_v4  ;;  %v479_v3 = vcvt.s32.f32 %v415_v61  ;;  %v478_v4 = vcvt.s32.f32 %v414_v45  ;;  %v2753_v61 = vld [vmem:[#allocation25_spill] sm:$0xff] }
 0x16d   : > { %v1164_v15 = vpop.permute.xlu1 %1163  ;;  %v1159_v12 = vpop.permute.xlu0 %1158  ;;  %v484_v32 = vcvt.s32.f32 %v420_v23 }
 0x16e   : > { %2065 = vst [vmem:[%s2544_s17 + $0xa8] sm:$0xff] %v1993_v11   ;;  %v1301_v8 = vadd.f32 %v1164_v15, %v917_v60  ;;  %v1300_v37 = vadd.f32 %v1159_v12, %v916_v51  ;;  %v416_v60 = vand.u32 255, %v352_v10  ;;  %v419_v15 = vand.u32 255, %v355_v33  ;;  %v2755_v33 = vld [vmem:[#allocation27_spill] sm:$0xff] }
 0x16f   : > { %v927_v54 = vmul.f32 %v2748_v38, %v479_v3 }
 0x170   : > { %v1998_v19 = vpack.c.bf16 %v1301_v8, %v1300_v37  ;;  %v481_v8 = vcvt.s32.f32 %v417_v6  ;;  %v418_v37 = vand.u32 255, %v354_v22  ;;  %v480_v26 = vcvt.s32.f32 %v416_v60 }
 0x171   : > { %v1174_v20 = vpop.permute.xlu1 %1173  ;;  %v1169_v5 = vpop.permute.xlu0 %1168 }
 0x172   : > { %2066 = vst [vmem:[%s2544_s17 + $0xb0] sm:$0xff] %v1998_v19   ;;  %v1303_v24 = vadd.f32 %v1174_v20, %v919_v25  ;;  %v1302_v48 = vadd.f32 %v1169_v5, %v918_v16  ;;  %v926_v25 = vmul.f32 %v2749_v14, %v478_v4  ;;  %v483_v20 = vcvt.s32.f32 %v419_v15 }
 0x173   : > { %v929_v58 = vmul.f32 %v2750_v57, %v481_v8 }
 0x174   : > { %v2003_v29 = vpack.c.bf16 %v1303_v24, %v1302_v48  ;;  %v482_v24 = vcvt.s32.f32 %v418_v37  ;;  %v421_v48 = vand.u32 255, %v357_v40 }
 0x175   : > { %v1184_v18 = vpop.permute.xlu1 %1183  ;;  %v1179_v30 = vpop.permute.xlu0 %1178 }
 0x176   : > { %2067 = vst [vmem:[%s2544_s17 + $0xb8] sm:$0xff] %v2003_v29   ;;  %v1305_v59 = vadd.f32 %v1184_v18, %v921_v42  ;;  %v1304_v2 = vadd.f32 %v1179_v30, %v920_v35  ;;  %v928_v42 = vmul.f32 %v2751_v41, %v480_v26  ;;  %v485_v30 = vcvt.s32.f32 %v421_v48 }
 0x177   : > { %v930_v45 = vmul.f32 %v2753_v61, %v482_v24 }
 0x178   : > { %v2008_v39 = vpack.c.bf16 %v1305_v59, %v1304_v2  ;;  %v423_v59 = vand.u32 255, %v359_v31  ;;  %v2752_v2 = vld [vmem:[#allocation24_spill] sm:$0xff] }
 0x179   : > { %v1194_v0 = vpop.permute.xlu1 %1193  ;;  %v1189_v56 = vpop.permute.xlu0 %1188  ;;  %v931_v36 = vmul.f32 %v2752_v2, %v483_v20 }
 0x17a   : > { %2068 = vst [vmem:[%s2544_s17 + $0xc0] sm:$0xff] %v2008_v39   ;;  %v1307_v34 = vadd.f32 %v1194_v0, %v923_v46  ;;  %v1306_v21 = vadd.f32 %v1189_v56, %v922_v9  ;;  %v487_v39 = vcvt.s32.f32 %v423_v59  ;;  %v2754_v0 = vld [vmem:[#allocation26_spill] sm:$0xff] }
 0x17b   : > { %v933_v56 = vmul.f32 %v2754_v0, %v485_v30 }
 0x17c   : > { %v2013_v51 = vpack.c.bf16 %v1307_v34, %v1306_v21  ;;  %v932_v34 = vmul.f32 %v2755_v33, %v484_v32  ;;  %v486_v21 = vcvt.s32.f32 %v422_v62 }
 0x17d   : > { %v1204_v7 = vpop.permute.xlu1 %1203  ;;  %v1199_v11 = vpop.permute.xlu0 %1198 }
 0x17e   : > { %2069 = vst [vmem:[%s2544_s17 + $0xc8] sm:$0xff] %v2013_v51   ;;  %v1309_v12 = vadd.f32 %v1204_v7, %v925_v50  ;;  %v1308_v13 = vadd.f32 %v1199_v11, %v924_v52  ;;  %v2756_v50 = vld [vmem:[#allocation28_spill] sm:$0xff]  ;;  %v2757_v52 = vld [vmem:[#allocation29_spill] sm:$0xff] }
 0x17f   : > { %v935_v28 = vmul.f32 %v2756_v50, %v487_v39  ;;  %v934_v60 = vmul.f32 %v2757_v52, %v486_v21 }
 0x180   : > { %v2018_v16 = vpack.c.bf16 %v1309_v12, %v1308_v13 }
 0x181   : > { %v1214_v1 = vpop.permute.xlu1 %1213  ;;  %v1209_v19 = vpop.permute.xlu0 %1208 }
 0x182   : > { %2070 = vst [vmem:[%s2544_s17 + $0xd0] sm:$0xff] %v2018_v16   ;;  %v1311_v5 = vadd.f32 %v1214_v1, %v927_v54  ;;  %v1310_v44 = vadd.f32 %v1209_v19, %v926_v25 }
 0x184   : > { %v2023_v35 = vpack.c.bf16 %v1311_v5, %v1310_v44 }
 0x185   : > { %v1224_v17 = vpop.permute.xlu1 %1223  ;;  %v1219_v27 = vpop.permute.xlu0 %1218 }
 0x186   : > { %2071 = vst [vmem:[%s2544_s17 + $0xd8] sm:$0xff] %v2023_v35   ;;  %v1313_v29 = vadd.f32 %v1224_v17, %v929_v58  ;;  %v1312_v18 = vadd.f32 %v1219_v27, %v928_v42 }
 0x188   : > { %v2028_v47 = vpack.c.bf16 %v1313_v29, %v1312_v18 }
 0x189   : > { %v1234_v46 = vpop.permute.xlu1 %1233  ;;  %v1229_v43 = vpop.permute.xlu0 %1228 }
 0x18a   : > { %2072 = vst [vmem:[%s2544_s17 + $0xe0] sm:$0xff] %v2028_v47   ;;  %v1315_v9 = vadd.f32 %v1234_v46, %v931_v36  ;;  %v1314_v10 = vadd.f32 %v1229_v43, %v930_v45 }
 0x18c   : > { %v2033_v3 = vpack.c.bf16 %v1315_v9, %v1314_v10 }
 0x18d   : > { %v1244_v4 = vpop.permute.xlu1 %1243  ;;  %v1239_v6 = vpop.permute.xlu0 %1238 }
 0x18e   : > { %2073 = vst [vmem:[%s2544_s17 + $0xe8] sm:$0xff] %v2033_v3   ;;  %v1317_v22 = vadd.f32 %v1244_v4, %v933_v56  ;;  %v1316_v49 = vadd.f32 %v1239_v6, %v932_v34 }
 0x190   : > { %v2038_v55 = vpack.c.bf16 %v1317_v22, %v1316_v49 }
 0x191   : > { %v1254_v51 = vpop.permute.xlu1 %1253  ;;  %v1249_v7 = vpop.permute.xlu0 %1248 }
 0x192   : > { %2074 = vst [vmem:[%s2544_s17 + $0xf0] sm:$0xff] %v2038_v55   ;;  %v1319_v11 = vadd.f32 %v1254_v51, %v935_v28  ;;  %v1318_v15 = vadd.f32 %v1249_v7, %v934_v60 }
 0x194   : > { %v2043_v12 = vpack.c.bf16 %v1319_v11, %v1318_v15 }
 0x196   : > { %2075 = vst [vmem:[%s2544_s17 + $0xf8] sm:$0xff] %v2043_v12  }
 0x197   : > { %2133 = shalt.err (!%p2130_p4)
}
 0x198   : > { %s2134_s4 = scalar_lea.hbm %s2655_s26, 4096  ;;  %s2138_s7 = scalar_lea.hbm %s2705_s3, 8192 }
 0x199   : > { %p2135_p7 = scmp.ne.s32.totalorder %s2655_s26, %s2134_s4  ;;  %p2139_p10 = scmp.lt.s32.totalorder %s2655_s26, %s2705_s3 }
 0x19a   : > { %p2140_p11 = scmp.lt.s32.totalorder %s2138_s7, %s2134_s4 }
 0x19b   : > { %p2136_p8 = pnand %p2135_p7, %p2244_p5 }
 0x19c   : > { %p2141_p12 = por %p2140_p11, %p2139_p10 }
 0x19d   : > { %p2137_p9 = pneg %p2136_p8 }
 0x19f   : > { %p2142_p13 = pnand %p2141_p12, %p2137_p9 }
 0x1a1   : > { %2145 = shalt.err (!%p2142_p13)
}
 0x1a2   : > { %s2184_s10 = smov 64   ;;  %s2185_s11 = smov 4  }
 0x1a3   : > { %2076 = dma.vmem_to_hbm [thread:$0]  (%p2244_p5), %s2657_s20, 4096, %s2655_s26, %s2662_s16, %s2184_s10, %s2184_s10, %s2185_s11  }
 0x1a4 PF: > { %p2082_p0 = scmp.ge.s32.totalorder %s2180_s15, 2  ;;  %s1669_s17 = sand.u32 1, %s2168_s12  }
 0x1a5   : > { %s1670_s19 = scalar_lea.sflag [#allocation3], %s1669_s17 }
 0x1a6   : > { %p2079_p1 = pnand %p2082_p0, %p2248_p6 }
 0x1a8   : > { %p2080_p2 = pneg %p2079_p1 }
 0x1aa   : > { %2163 = dma.done.wait (%p2080_p2), %s1670_s19, 4096  }
 0x1ab   : > { %2165 = vsyncadd (%p2080_p2), %s1670_s19, 4294963200  ;;  %p13_p3 = scmp.ge.s32.totalorder %s2231_s18, 4   ;;  %s2758_s12 = smov %s2172_s13 }
 0x1ac   : > { %s2759_s13 = smov %s2176_s14  ;;  %s2760_s14 = smov %s2242_s21 }
 0x1ad   : > { %s2761_s15 = smov %s2231_s18  ;;  %15 = sbr.rel (!%p13_p3) target bundleno = 3 (0x3), region = 73 }
 0x1b2   :  { %1675 = vsyncpa [#allocation3], 1 }
 0x1b3   :  { %1677 = vsyncpa [#allocation3 + $0x1], 1 }

</bundles_post_ra>
